<compile_context>
chip_gen: v7x
topology: tpu7x:2x2x1
jax: 0.10.0
libtpu: 0.0.40
codegen_flags: <defaults>
</compile_context>

<pallas_src>
import functools

import jax
import jax.numpy as jnp
from jax.experimental import pallas as pl
from jax.experimental.pallas import tpu as pltpu


# ---------------------------------------------------------------------------
# Path 1: VMEM slab kernel (store-only; interior + wrap borders).
# ---------------------------------------------------------------------------
def _circular_pad_vmem_kernel(x_ref, o_ref, *, pad_left, pad_right, pad_top,
                              pad_bot):
    # x_ref: (B, H, W) VMEM tile; o_ref: (B, H+pt+pb, W+pl+pr) VMEM tile.
    _, H, W = x_ref.shape

    # Interior.
    o_ref[:, pad_top:pad_top + H, pad_left:pad_left + W] = x_ref[...]

    # Left / right column wraps for the interior rows.
    if pad_left > 0:
        o_ref[:, pad_top:pad_top + H, 0:pad_left] = x_ref[:, :, W - pad_left:]
    if pad_right > 0:
        o_ref[:, pad_top:pad_top + H, pad_left + W:] = x_ref[:, :, 0:pad_right]

    # Top wrap rows (come from the bottom rows of x).
    if pad_top > 0:
        o_ref[:, 0:pad_top, pad_left:pad_left + W] = x_ref[:, H - pad_top:, :]
        if pad_left > 0:
            o_ref[:, 0:pad_top, 0:pad_left] = x_ref[:, H - pad_top:, W - pad_left:]
        if pad_right > 0:
            o_ref[:, 0:pad_top, pad_left + W:] = x_ref[:, H - pad_top:, 0:pad_right]

    # Bottom wrap rows (come from the top rows of x).
    if pad_bot > 0:
        o_ref[:, pad_top + H:, pad_left:pad_left + W] = x_ref[:, 0:pad_bot, :]
        if pad_left > 0:
            o_ref[:, pad_top + H:, 0:pad_left] = x_ref[:, 0:pad_bot, W - pad_left:]
        if pad_right > 0:
            o_ref[:, pad_top + H:, pad_left + W:] = x_ref[:, 0:pad_bot, 0:pad_right]


def _round_up(x, m):
    return -(-x // m) * m


def _vmem_plan():
    """Per-generation (block_budget_bytes, vmem_limit_bytes, target_grid_steps)."""
    vmem_cap = 128 * 1024 * 1024
    try:
        info = pltpu.get_tpu_info()
        vmem_cap = int(getattr(info, "vmem_capacity_bytes", vmem_cap))
    except Exception:
        pass
    if vmem_cap <= 96 * 1024 * 1024:
        # v7x-class: 64 MiB physical per TensorCore, 2 TCs share the grid ->
        # smaller slabs, target >= 8 grid steps (>= 4 per core) for pipelining.
        return 22 * 1024 * 1024, 48 * 1024 * 1024, 8
    # v5e / v6e: 128 MiB physical, single TensorCore -> bigger slabs amortize the
    # ~0.35 us per-step overhead; 4-8 steps keeps steady-state pipelining.
    return 28 * 1024 * 1024, 64 * 1024 * 1024, 4


def _pick_channel_block(nc, h, w, ho, wo, dtype, budget_bytes, target_steps):
    """Channel-block size B for the (B, H, W) -> (B, Ho, Wo) VMEM path.

    Padding-aware: the last two dims of a VMEM block are physically tiled to
    (sublane, 128), sublane = 8 (4-byte), 16 (2-byte), 32 (1-byte), so small
    H/W tiles occupy far more VMEM than their logical bytes.
    """
    itemsize = jnp.dtype(dtype).itemsize
    sub = max(8, 32 // itemsize)

    def padded_bytes(r, c):
        return _round_up(r, sub) * _round_up(c, 128) * itemsize

    # 2x: BlockSpec double-buffers both the input and the output stream.
    per_channel = 2 * (padded_bytes(h, w) + padded_bytes(ho, wo))
    b_fit = max(1, budget_bytes // per_channel)
    # Keep >= target_steps grid steps (when there are that many channels) so the
    # pipeline reaches steady state and v7x can shard the grid across its 2 TCs.
    b_steps = max(1, nc // target_steps) if nc >= target_steps else nc
    b = max(1, min(nc, b_fit, b_steps))

    # Best effort: even number of grid steps so both v7x TensorCores get equal
    # work (harmless on single-TC v5e/v6e).
    steps = -(-nc // b)
    tries = 0
    while steps > 1 and steps % 2 == 1 and b > 1 and tries < 64:
        b -= 1
        steps = -(-nc // b)
        tries += 1
    return b


# ---------------------------------------------------------------------------
# Path 2: pure HBM->HBM DMA kernel (no VMEM round trip, no vector stores).
# Used when rows are wide enough that the strided per-row DMA runs are efficient.
# ---------------------------------------------------------------------------
_DMA_MIN_ROW_BYTES = 512


def _circular_pad_hbm_dma_kernel(x_hbm, o_hbm, sems, *, pad_left, pad_right,
                                 pad_top, pad_bot, H, W):
    src_rows = {"mid": slice(0, H)}
    dst_rows = {"mid": slice(pad_top, pad_top + H)}
    if pad_top > 0:
        src_rows["top"] = slice(H - pad_top, H)
        dst_rows["top"] = slice(0, pad_top)
    if pad_bot > 0:
        src_rows["bot"] = slice(0, pad_bot)
        dst_rows["bot"] = slice(pad_top + H, pad_top + H + pad_bot)

    src_cols = {"mid": slice(0, W)}
    dst_cols = {"mid": slice(pad_left, pad_left + W)}
    if pad_left > 0:
        src_cols["left"] = slice(W - pad_left, W)
        dst_cols["left"] = slice(0, pad_left)
    if pad_right > 0:
        src_cols["right"] = slice(0, pad_right)
        dst_cols["right"] = slice(pad_left + W, pad_left + W + pad_right)

    copies = []
    for rk in src_rows:
        for ck in src_cols:
            i = len(copies)
            copies.append(pltpu.make_async_copy(
                x_hbm.at[:, src_rows[rk], src_cols[ck]],
                o_hbm.at[:, dst_rows[rk], dst_cols[ck]],
                sems.at[i]))
    for cp in copies:
        cp.start()
    for cp in copies:
        cp.wait()


# ---------------------------------------------------------------------------
# Wrapper.
# ---------------------------------------------------------------------------
def circular_pad(x, padding=(1, 1, 1, 1)):
    """Circular (wrap) padding matching F.pad(x, pad=padding, mode='circular').

    x: (N, C, H, W); padding = (pad_left, pad_right, pad_top, pad_bot).
    """
    pad_l, pad_r, pad_t, pad_b = padding
    N, C, H, W = x.shape
    assert pad_l <= W and pad_r <= W and pad_t <= H and pad_b <= H, \
        "circular pad size must not exceed the corresponding input dim"

    Ho = H + pad_t + pad_b
    Wo = W + pad_l + pad_r
    NC = N * C
    x_flat = x.reshape(NC, H, W)
    itemsize = jnp.dtype(x.dtype).itemsize

    if W * itemsize >= _DMA_MIN_ROW_BYTES:
        # Wide rows: pure HBM->HBM DMA (no VMEM round trip, no vector stores).
        kernel = functools.partial(
            _circular_pad_hbm_dma_kernel,
            pad_left=pad_l, pad_right=pad_r, pad_top=pad_t, pad_bot=pad_b,
            H=H, W=W)
        out_flat = pl.pallas_call(
            kernel,
            out_shape=jax.ShapeDtypeStruct((NC, Ho, Wo), x.dtype),
            in_specs=[pl.BlockSpec(memory_space=pl.ANY)],
            out_specs=pl.BlockSpec(memory_space=pl.ANY),
            scratch_shapes=[pltpu.SemaphoreType.DMA((9,))],
            compiler_params=pltpu.CompilerParams(has_side_effects=True),
        )(x_flat)
        return out_flat.reshape(N, C, Ho, Wo)

    budget, vmem_limit, target_steps = _vmem_plan()
    B = _pick_channel_block(NC, H, W, Ho, Wo, x.dtype, budget, target_steps)
    grid = (pl.cdiv(NC, B),)  # partial last block: OOB writes are dropped

    kernel = functools.partial(
        _circular_pad_vmem_kernel,
        pad_left=pad_l, pad_right=pad_r, pad_top=pad_t, pad_bot=pad_b)

    out_flat = pl.pallas_call(
        kernel,
        out_shape=jax.ShapeDtypeStruct((NC, Ho, Wo), x.dtype),
        grid=grid,
        # Last two block dims equal the full array dims -> (8,128) rule is
        # satisfied for any H/W.
        in_specs=[pl.BlockSpec((B, H, W), lambda i: (i, 0, 0))],
        out_specs=pl.BlockSpec((B, Ho, Wo), lambda i: (i, 0, 0)),
        compiler_params=pltpu.CompilerParams(
            dimension_semantics=("parallel",),
            vmem_limit_bytes=vmem_limit,
        ),
    )(x_flat)
    return out_flat.reshape(N, C, Ho, Wo)


if __name__ == "__main__":
    key = jax.random.PRNGKey(0)
    N, C, H, W = 2, 4, 16, 16
    x = jax.random.normal(key, (N, C, H, W), dtype=jnp.float32)

    padding = (1, 1, 1, 1)  # (left, right, top, bottom) -- F.pad convention
    out = jax.block_until_ready(circular_pad(x, padding))

    # Reference: jnp.pad with mode='wrap' reproduces circular padding.
    pad_l, pad_r, pad_t, pad_b = padding
    ref = jnp.pad(x, ((0, 0), (0, 0), (pad_t, pad_b), (pad_l, pad_r)),
                  mode="wrap")

    assert out.shape == (N, C, H + pad_t + pad_b, W + pad_l + pad_r), out.shape
    assert out.dtype == x.dtype
    assert bool(jnp.array_equal(out, ref)), "mismatch vs reference circular pad"

    print("KERNEL_OK")
</pallas_src>

<mosaic_0001>
module attributes {stable_mosaic.version = 11 : i64} {
  func.func @_circular_pad_vmem_kernel(%arg0: i32, %arg1: memref<2x16x16xf32, #tpu.memory_space<vmem>>, %arg2: memref<2x18x18xf32, #tpu.memory_space<vmem>>) attributes {dimension_semantics = [#tpu.dimension_semantics<parallel>], iteration_bounds = array<i64: 4>, scalar_prefetch = 0 : i64, scratch_operands = 0 : i64, tpu.core_type = #tpu.core_type<tc>, window_params = [{transform_indices = @transform_0, window_bounds = array<i64: 2, 16, 16>}, {transform_indices = @transform_1, window_bounds = array<i64: 2, 18, 18>}]} {
    %c0 = arith.constant 0 : index
    %c0_0 = arith.constant 0 : index
    %c0_1 = arith.constant 0 : index
    %0 = vector.load %arg1[%c0, %c0_0, %c0_1] : memref<2x16x16xf32, #tpu.memory_space<vmem>>, vector<2x16x16xf32>
    %c0_2 = arith.constant 0 : index
    %c1 = arith.constant 1 : index
    %c1_3 = arith.constant 1 : index
    %1 = vector.load %arg2[%c0_2, %c1, %c1_3] : memref<2x18x18xf32, #tpu.memory_space<vmem>>, vector<2x16x16xf32>
    tpu.vector_store %arg2[%c0_2, %c1, %c1_3], %0 {strides = array<i32>} : memref<2x18x18xf32, #tpu.memory_space<vmem>>, vector<2x16x16xf32>,
    %c0_4 = arith.constant 0 : index
    %c0_5 = arith.constant 0 : index
    %c15 = arith.constant 15 : index
    %2 = vector.load %arg1[%c0_4, %c0_5, %c15] : memref<2x16x16xf32, #tpu.memory_space<vmem>>, vector<2x16x1xf32>
    %c0_6 = arith.constant 0 : index
    %c1_7 = arith.constant 1 : index
    %c0_8 = arith.constant 0 : index
    %3 = vector.load %arg2[%c0_6, %c1_7, %c0_8] : memref<2x18x18xf32, #tpu.memory_space<vmem>>, vector<2x16x1xf32>
    tpu.vector_store %arg2[%c0_6, %c1_7, %c0_8], %2 {strides = array<i32>} : memref<2x18x18xf32, #tpu.memory_space<vmem>>, vector<2x16x1xf32>,
    %c0_9 = arith.constant 0 : index
    %c0_10 = arith.constant 0 : index
    %c0_11 = arith.constant 0 : index
    %4 = vector.load %arg1[%c0_9, %c0_10, %c0_11] : memref<2x16x16xf32, #tpu.memory_space<vmem>>, vector<2x16x1xf32>
    %c0_12 = arith.constant 0 : index
    %c1_13 = arith.constant 1 : index
    %c17 = arith.constant 17 : index
    %5 = vector.load %arg2[%c0_12, %c1_13, %c17] : memref<2x18x18xf32, #tpu.memory_space<vmem>>, vector<2x16x1xf32>
    tpu.vector_store %arg2[%c0_12, %c1_13, %c17], %4 {strides = array<i32>} : memref<2x18x18xf32, #tpu.memory_space<vmem>>, vector<2x16x1xf32>,
    %c0_14 = arith.constant 0 : index
    %c15_15 = arith.constant 15 : index
    %c0_16 = arith.constant 0 : index
    %6 = vector.load %arg1[%c0_14, %c15_15, %c0_16] : memref<2x16x16xf32, #tpu.memory_space<vmem>>, vector<2x1x16xf32>
    %c0_17 = arith.constant 0 : index
    %c0_18 = arith.constant 0 : index
    %c1_19 = arith.constant 1 : index
    %7 = vector.load %arg2[%c0_17, %c0_18, %c1_19] : memref<2x18x18xf32, #tpu.memory_space<vmem>>, vector<2x1x16xf32>
    tpu.vector_store %arg2[%c0_17, %c0_18, %c1_19], %6 {strides = array<i32>} : memref<2x18x18xf32, #tpu.memory_space<vmem>>, vector<2x1x16xf32>,
    %c0_20 = arith.constant 0 : index
    %c15_21 = arith.constant 15 : index
    %c15_22 = arith.constant 15 : index
    %8 = vector.load %arg1[%c0_20, %c15_21, %c15_22] : memref<2x16x16xf32, #tpu.memory_space<vmem>>, vector<2x1x1xf32>
    %c0_23 = arith.constant 0 : index
    %c0_24 = arith.constant 0 : index
    %c0_25 = arith.constant 0 : index
    %9 = vector.load %arg2[%c0_23, %c0_24, %c0_25] : memref<2x18x18xf32, #tpu.memory_space<vmem>>, vector<2x1x1xf32>
    tpu.vector_store %arg2[%c0_23, %c0_24, %c0_25], %8 {strides = array<i32>} : memref<2x18x18xf32, #tpu.memory_space<vmem>>, vector<2x1x1xf32>,
    %c0_26 = arith.constant 0 : index
    %c15_27 = arith.constant 15 : index
    %c0_28 = arith.constant 0 : index
    %10 = vector.load %arg1[%c0_26, %c15_27, %c0_28] : memref<2x16x16xf32, #tpu.memory_space<vmem>>, vector<2x1x1xf32>
    %c0_29 = arith.constant 0 : index
    %c0_30 = arith.constant 0 : index
    %c17_31 = arith.constant 17 : index
    %11 = vector.load %arg2[%c0_29, %c0_30, %c17_31] : memref<2x18x18xf32, #tpu.memory_space<vmem>>, vector<2x1x1xf32>
    tpu.vector_store %arg2[%c0_29, %c0_30, %c17_31], %10 {strides = array<i32>} : memref<2x18x18xf32, #tpu.memory_space<vmem>>, vector<2x1x1xf32>,
    %c0_32 = arith.constant 0 : index
    %c0_33 = arith.constant 0 : index
    %c0_34 = arith.constant 0 : index
    %12 = vector.load %arg1[%c0_32, %c0_33, %c0_34] : memref<2x16x16xf32, #tpu.memory_space<vmem>>, vector<2x1x16xf32>
    %c0_35 = arith.constant 0 : index
    %c17_36 = arith.constant 17 : index
    %c1_37 = arith.constant 1 : index
    %13 = vector.load %arg2[%c0_35, %c17_36, %c1_37] : memref<2x18x18xf32, #tpu.memory_space<vmem>>, vector<2x1x16xf32>
    tpu.vector_store %arg2[%c0_35, %c17_36, %c1_37], %12 {strides = array<i32>} : memref<2x18x18xf32, #tpu.memory_space<vmem>>, vector<2x1x16xf32>,
    %c0_38 = arith.constant 0 : index
    %c0_39 = arith.constant 0 : index
    %c15_40 = arith.constant 15 : index
    %14 = vector.load %arg1[%c0_38, %c0_39, %c15_40] : memref<2x16x16xf32, #tpu.memory_space<vmem>>, vector<2x1x1xf32>
    %c0_41 = arith.constant 0 : index
    %c17_42 = arith.constant 17 : index
    %c0_43 = arith.constant 0 : index
    %15 = vector.load %arg2[%c0_41, %c17_42, %c0_43] : memref<2x18x18xf32, #tpu.memory_space<vmem>>, vector<2x1x1xf32>
    tpu.vector_store %arg2[%c0_41, %c17_42, %c0_43], %14 {strides = array<i32>} : memref<2x18x18xf32, #tpu.memory_space<vmem>>, vector<2x1x1xf32>,
    %c0_44 = arith.constant 0 : index
    %c0_45 = arith.constant 0 : index
    %c0_46 = arith.constant 0 : index
    %16 = vector.load %arg1[%c0_44, %c0_45, %c0_46] : memref<2x16x16xf32, #tpu.memory_space<vmem>>, vector<2x1x1xf32>
    %c0_47 = arith.constant 0 : index
    %c17_48 = arith.constant 17 : index
    %c17_49 = arith.constant 17 : index
    %17 = vector.load %arg2[%c0_47, %c17_48, %c17_49] : memref<2x18x18xf32, #tpu.memory_space<vmem>>, vector<2x1x1xf32>
    tpu.vector_store %arg2[%c0_47, %c17_48, %c17_49], %16 {strides = array<i32>} : memref<2x18x18xf32, #tpu.memory_space<vmem>>, vector<2x1x1xf32>,
    return
  }
  func.func @transform_0(%arg0: i32) -> (i32, i32, i32) {
    %c0_i32 = arith.constant 0 : i32
    %c0_i32_0 = arith.constant 0 : i32
    %c0_i32_1 = arith.constant 0 : i32
    return %arg0, %c0_i32, %c0_i32_0 : i32, i32, i32
  }
  func.func @transform_1(%arg0: i32) -> (i32, i32, i32) {
    %c0_i32 = arith.constant 0 : i32
    %c0_i32_0 = arith.constant 0 : i32
    %c0_i32_1 = arith.constant 0 : i32
    return %arg0, %c0_i32, %c0_i32_0 : i32, i32, i32
  }
}

</mosaic_0001>

<bundles_post_ra>
// kernel: tpu_custom_call.1
= control target key start
LH: loop header
LB: loop body
LE: loop exit
PB: predicated region body
PF: predicated region fallthrough
CT: control target
= control target key end

     0   :  { %6 = vsyncpa [#allocation3], 0  ;;  %s770_s0 = inlined_call_operand.hbm [shape: f32[8,16,16], index: 0, kind: input, shape index: {}]   ;;  %s771_s1 = inlined_call_operand.hbm [shape: f32[8,18,18], index: 1, kind: output, shape index: {}]  }
   0x1   :  { %8 = vsyncpa [#allocation3 + $0x1], 0 }
   0x2   :  { %9 = vsyncpa [#allocation4], 0 }
   0x3   :  { %11 = vsyncpa [#allocation4 + $0x1], 0  ;;  %s564_s6 = smov 0   ;;  %s566_s7 = smov 0  }
   0x4   :  { %s568_s8 = smov 0   ;;  %s570_s9 = smov 0  }
   0x5 LB: > { %s585_s10 = sadd.s32 4294967295, %s543_s9   ;;  %s376_s11 = sadd.s32 4294967294, %s543_s9   ;;  %s543_s9 = sphi %s570_s9, %s783_s9   ;;  %s539_s8 = sphi %s568_s8, %s782_s8   ;;  %s535_s7 = sphi %s566_s7, %s781_s7   ;;  %s531_s6 = sphi %s564_s6, %s780_s6  }
   0x6   : > { %s589_s12 = sadd.s32 1, %s543_s9   ;;  %s24_s13 = sadd.s32 1, %s539_s8 }
   0x7   : > { %s21_s14 = ssub.s32 %s543_s9, %s589_s12  ;;  %p31_p0 = scmp.ne.s32.totalorder %s539_s8, %s535_s7 }
   0x8   : > { %p22_p1 = scmp.eq.s32.totalorder %s21_s14, 0  ;;  %p32_p2 = scmp.eq.s32.totalorder %s543_s9, 0 }
   0x9   : > { %p37_p3 = scmp.ne.s32.totalorder %s535_s7, %s531_s6  ;;  %p38_p4 = scmp.eq.s32.totalorder %s585_s10, 0 }
   0xa   : > { %s601_s15 = scalar_select %p22_p1, %s539_s8, %s24_s13  }
   0xb   : > { %p603_p5 = por %p32_p2, %p31_p0  ;;  %p607_p6 = por %p38_p4, %p37_p3 }
   0xc   : > { %p61_p7 = scmp.eq.s32.totalorder %s585_s10, 3  ;;  %p67_p8 = scmp.eq.s32.totalorder %s376_s11, 3 }
   0xd   : > { %p406_p9 = scmp.lt.s32.totalorder %s543_s9, 4  ;;  %s87_s20 = sand.u32 1, %s539_s8  }
   0xe   : > { %p613_p10 = por %p61_p7, %p31_p0  ;;  %p617_p11 = por %p67_p8, %p37_p3 }
   0xf   : > { %s391_s21 = sshll.u32 %s543_s9, 9  ;;  %s379_s22 = sshll.u32 %s87_s20, 5 }
  0x10   : > { %s775_s18 = scalar_select %p613_p10, 1, 0 }
  0x11   : > { %s776_s19 = scalar_select %p617_p11, 1, 0 }
  0x12   : > { %s626_s25 = scalar_lea.hbm %s770_s0, %s391_s21  ;;  %s91_s26 = scalar_lea.vmem [#allocation2], %s379_s22 }
  0x13   : > { %s99_s27 = sshll.u32 %s91_s26, 4  ;;  %p630_p12 = pnand %p406_p9, %p603_p5  ;;  %s634_s27 = int_to_ptr.vmem [resolvable:$true] %s99_s27 }
  0x14   : > { %s636_s29 = scalar_lea.sflag [#allocation3], %s87_s20  ;;  %s447_s30 = scalar_lea.hbm %s626_s25, 512 }
  0x15   : > { %p448_p13 = scmp.ne.s32.totalorder %s626_s25, %s447_s30  ;;  %p449_p0 = pneg %p630_p12 }
  0x16   : > { %s452_s4 = scalar_lea.hbm %s770_s0, 2048  ;;  %p453_p3 = scmp.lt.u32.totalorder %s626_s25, %s770_s0 }
  0x17   : > { %p450_p1 = pnand %p449_p0, %p448_p13  ;;  %p454_p4 = scmp.lt.u32.totalorder %s452_s4, %s447_s30 }
  0x18   : > { %p456_p7 = scmp.lt.u32.totalorder %s447_s30, %s626_s25 }
  0x19   : > { %p451_p2 = pneg %p450_p1  ;;  %p455_p5 = por %p454_p4, %p453_p3 }
  0x1b   : > { %p457_p8 = por %p456_p7, %p455_p5 }
  0x1d   : > { %p458_p9 = pnand %p457_p8, %p451_p2 }
  0x1f   : > { %461 = shalt.err (!%p458_p9)
}
  0x20   : > { %s462_s13 = scalar_lea.vmem %s634_s27, 512  ;;  %s545_s14 = smov [#allocation2]  }
  0x21   : > { %p463_p13 = scmp.ne.s32.totalorder %s634_s27, %s462_s13  ;;  %s467_s16 = sshll.u32 %s545_s14, 4  ;;  %s468_s16 = int_to_ptr.vmem [resolvable:$false] %s467_s16 }
  0x22   : > { %s469_s20 = scalar_lea.vmem %s468_s16, 1024  ;;  %p470_p10 = scmp.lt.s32.totalorder %s634_s27, %s468_s16 }
  0x23   : > { %p465_p1 = pnand %p463_p13, %p449_p0  ;;  %p471_p3 = scmp.lt.s32.totalorder %s469_s20, %s462_s13 }
  0x25   : > { %p466_p11 = pneg %p465_p1  ;;  %p472_p4 = por %p471_p3, %p470_p10 }
  0x27   : > { %p473_p5 = pnand %p472_p4, %p466_p11 }
  0x29   : > { %476 = shalt.err (!%p473_p5)
}
  0x2a   : > { %s546_s21 = smov 128   ;;  %s547_s22 = smov 8  }
  0x2b   : > { %401 = dma.hbm_to_vmem [thread:$0]  (!%p630_p12), %s626_s25, 512, %s634_s27, %s636_s29, %s546_s21, %s546_s21, %s547_s22  }
  0x2c   : > { %p383_p0 = scmp.ge.s32.totalorder %s543_s9, 1  ;;  %p107_p2 = scmp.lt.s32.totalorder %s543_s9, 5 }
  0x2e   : > { %p108_p7 = pnand %p383_p0, %p107_p2 }
  0x2f   : > { %s667_s23 = sand.u32 (!%p108_p7), 1, %s535_s7  }
  0x30   : > { %111 = sbr.rel (%p108_p7) target bundleno = 231 (0xe7), region = 24  ;;  %s384_s24 = sshll.u32 (!%p108_p7), %s667_s23, 5 }
  0x31   : > { %s114_s26 = scalar_lea.sflag (!%p108_p7), [#allocation3], %s667_s23  ;;  %s671_s30 = scalar_lea.vmem (!%p108_p7), [#allocation2], %s384_s24 }
  0x37   : > { %522 = dma.done.wait (%p607_p6), %s114_s26, 512  }
  0x38   : > { %524 = vsyncadd (%p607_p6), %s114_s26, 4294966784  ;;  %v140_v0 = vld [vmem:[%s671_s30 + $0x10] sm:$0xff]  ;;  %v138_v1 = vld [vmem:[%s671_s30] sm:$0xff]  ;;  %s548_s25 = smov 1   ;;  %s549_s17 = smov 113   ;;  %vm158_vm0 = vcmask 138248  }
  0x39   : > { %150 = vrot.lane.b32.xlu1 %v140_v0, %s548_s25  ;;  %146 = vrot.lane.b32.xlu0 %v138_v1, %s548_s25  ;;  %v141_v2 = vld [vmem:[%s671_s30 + $0x18] sm:$0xff]  ;;  %v139_v3 = vld [vmem:[%s671_s30 + $0x8] sm:$0xff]  ;;  %s550_s27 = smov 17   ;;  %s392_s28 = smul.u32 48, %s667_s23  ;;  %vm223_vm1 = vcmask 131080   ;;  %vm183_vm2 = vcmask 7168  }
  0x3a   : > { %v214_v4 = vld [vmem:[%s671_s30 + $0x1f] sm:$0x1]  ;;  %v213_v5 = vld [vmem:[%s671_s30 + $0xf] sm:$0x1]  ;;  %v253_v6 = vld [vmem:[%s671_s30 + $0x10] sm:$0x1] }
  0x3b   : > { %v252_v7 = vld [vmem:[%s671_s30] sm:$0x1]  ;;  %v227_v8 = vld [vmem:[%s671_s30 + $0x1f] sm:$0x1]  ;;  %v226_v9 = vld [vmem:[%s671_s30 + $0xf] sm:$0x1] }
  0x3c   : > { %v265_v10 = vld [vmem:[%s671_s30 + $0x10] sm:$0x1]  ;;  %v264_v11 = vld [vmem:[%s671_s30] sm:$0x1]  ;;  %v240_v12 = vld [vmem:[%s671_s30 + $0x1f] sm:$0x1] }
  0x3d   : > { %152 = vrot.lane.b32.xlu1 %v141_v2, %s548_s25  ;;  %148 = vrot.lane.b32.xlu0 %v139_v3, %s548_s25  ;;  %v239_v13 = vld [vmem:[%s671_s30 + $0xf] sm:$0x1]  ;;  %v277_v14 = vld [vmem:[%s671_s30 + $0x10] sm:$0x1]  ;;  %s694_s29 = scalar_lea.vmem [#allocation5], %s392_s28  ;;  %vm236_vm3 = vcmask 0  }
  0x3e   : > { %v276_v15 = vld [vmem:[%s671_s30] sm:$0x1]  ;;  %vm208_vm4 = vcmask 146568   ;;  %vm249_vm5 = vcmask 139400   ;;  %s393_s2 = smul.u32 768, %s585_s10  ;;  %s303_s3 = sshll.u32 %s694_s29, 4  ;;  %s725_s3 = int_to_ptr.vmem [resolvable:$true] %s303_s3 }
  0x3f   : > { %s289_s10 = scalar_lea.sflag [#allocation4], %s667_s23  ;;  %s477_s13 = scalar_lea.vmem %s725_s3, 768 }
  0x40   : > { %s723_s11 = scalar_lea.hbm %s771_s1, %s393_s2  ;;  %p478_p6 = scmp.ne.s32.totalorder %s725_s3, %s477_s13 }
  0x41   : > { %219 = vrot.lane.b32.xlu1 %v214_v4, %s548_s25  ;;  %217 = vrot.lane.b32.xlu0 %v213_v5, %s548_s25  ;;  %p778_p10 = scmp.ne.s32.totalorder %s775_s18, 0  ;;  %s551_s14 = smov [#allocation5]  }
  0x42   : > { %s481_s16 = sshll.u32 %s551_s14, 4  ;;  %s482_s16 = int_to_ptr.vmem [resolvable:$false] %s481_s16 }
  0x43   : > { %p479_p11 = pnand %p478_p6, %p778_p10  ;;  %s483_s20 = scalar_lea.vmem %s482_s16, 1536 }
  0x44   : > { %p484_p8 = scmp.lt.s32.totalorder %s725_s3, %s482_s16  ;;  %p485_p9 = scmp.lt.s32.totalorder %s483_s20, %s477_s13 }
  0x45   : > { %258 = vrot.lane.b32.xlu1 %v253_v6, %s548_s25  ;;  %256 = vrot.lane.b32.xlu0 %v252_v7, %s548_s25  ;;  %p480_p12 = pneg %p479_p11 }
  0x46   : > { %p486_p13 = por %p485_p9, %p484_p8 }
  0x48   : > { %p487_p1 = pnand %p486_p13, %p480_p12 }
  0x49   : > { %173 = vrot.lane.b32.xlu1 %v139_v3, %s549_s17  ;;  %171 = vrot.lane.b32.xlu0 %v138_v1, %s549_s17 }
  0x4d   : > { %177 = vrot.lane.b32.xlu1 %v141_v2, %s549_s17  ;;  %175 = vrot.lane.b32.xlu0 %v140_v0, %s549_s17 }
  0x51   : > { %232 = vrot.lane.b32.xlu1 %v227_v8, %s549_s17  ;;  %230 = vrot.lane.b32.xlu0 %v226_v9, %s549_s17 }
  0x55   : > { %270 = vrot.lane.b32.xlu1 %v265_v10, %s549_s17  ;;  %268 = vrot.lane.b32.xlu0 %v264_v11, %s549_s17 }
  0x59   : > { %198 = vrot.lane.b32.xlu1 %v139_v3, %s550_s27  ;;  %196 = vrot.lane.b32.xlu0 %v138_v1, %s550_s27 }
  0x5d   : > { %202 = vrot.lane.b32.xlu1 %v141_v2, %s550_s27  ;;  %200 = vrot.lane.b32.xlu0 %v140_v0, %s550_s27 }
  0x61   : > { %245 = vrot.lane.b32.xlu1 %v240_v12, %s550_s27  ;;  %243 = vrot.lane.b32.xlu0 %v239_v13, %s550_s27 }
  0x65   : > { %282 = vrot.lane.b32.xlu1 %v277_v14, %s550_s27  ;;  %280 = vrot.lane.b32.xlu0 %v276_v15, %s550_s27 }
  0xab   : > { %v151_v16 = vpop.permute.xlu1 %150  ;;  %v147_v17 = vpop.permute.xlu0 %146 }
  0xac   : > { %161 = vst.msk [vmem:[%s694_s29 + $0x19] sm:$0xff] %vm158_vm0, %v151_v16  ;;  %159 = vst.msk [vmem:[%s694_s29 + $0x1] sm:$0xff] %vm158_vm0, %v147_v17 }
  0xaf   : > { %v153_v18 = vpop.permute.xlu1 %152  ;;  %v149_v19 = vpop.permute.xlu0 %148 }
  0xb0   : > { %162 = vst.msk [vmem:[%s694_s29 + $0x21] sm:$0xff] %vm158_vm0, %v153_v18  ;;  %160 = vst.msk [vmem:[%s694_s29 + $0x9] sm:$0xff] %vm158_vm0, %v149_v19 }
  0xb3   : > { %v220_v20 = vpop.permute.xlu1 %219  ;;  %v218_v21 = vpop.permute.xlu0 %217 }
  0xb4   : > { %225 = vst.msk [vmem:[%s694_s29 + $0x18] sm:$0x1] %vm223_vm1, %v220_v20  ;;  %224 = vst.msk [vmem:[%s694_s29] sm:$0x1] %vm223_vm1, %v218_v21 }
  0xb7   : > { %v259_v22 = vpop.permute.xlu1 %258  ;;  %v257_v23 = vpop.permute.xlu0 %256 }
  0xb8   : > { %263 = vst.msk [vmem:[%s694_s29 + $0x29] sm:$0x1] %vm223_vm1, %v259_v22  ;;  %262 = vst.msk [vmem:[%s694_s29 + $0x11] sm:$0x1] %vm223_vm1, %v257_v23 }
  0xbb   : > { %v174_v24 = vpop.permute.xlu1 %173  ;;  %v172_v25 = vpop.permute.xlu0 %171 }
  0xbc   : > { %185 = vst.msk [vmem:[%s694_s29 + $0x9] sm:$0xff] %vm183_vm2, %v174_v24  ;;  %184 = vst.msk [vmem:[%s694_s29 + $0x1] sm:$0xff] %vm183_vm2, %v172_v25 }
  0xbf   : > { %v178_v26 = vpop.permute.xlu1 %177  ;;  %v176_v27 = vpop.permute.xlu0 %175 }
  0xc0   : > { %187 = vst.msk [vmem:[%s694_s29 + $0x21] sm:$0xff] %vm183_vm2, %v178_v26  ;;  %186 = vst.msk [vmem:[%s694_s29 + $0x19] sm:$0xff] %vm183_vm2, %v176_v27 }
  0xc3   : > { %v233_v28 = vpop.permute.xlu1 %232  ;;  %v231_v29 = vpop.permute.xlu0 %230 }
  0xc4   : > { %238 = vst.msk [vmem:[%s694_s29 + $0x18] sm:$0x1] %vm236_vm3, %v233_v28  ;;  %237 = vst.msk [vmem:[%s694_s29] sm:$0x1] %vm236_vm3, %v231_v29 }
  0xc7   : > { %v271_v30 = vpop.permute.xlu1 %270  ;;  %v269_v31 = vpop.permute.xlu0 %268 }
  0xc8   : > { %275 = vst.msk [vmem:[%s694_s29 + $0x29] sm:$0x1] %vm236_vm3, %v271_v30  ;;  %274 = vst.msk [vmem:[%s694_s29 + $0x11] sm:$0x1] %vm236_vm3, %v269_v31 }
  0xcb   : > { %v199_v32 = vpop.permute.xlu1 %198  ;;  %v197_v33 = vpop.permute.xlu0 %196 }
  0xcc   : > { %210 = vst.msk [vmem:[%s694_s29 + $0x9] sm:$0xff] %vm208_vm4, %v199_v32  ;;  %209 = vst.msk [vmem:[%s694_s29 + $0x1] sm:$0xff] %vm208_vm4, %v197_v33 }
  0xcf   : > { %v203_v34 = vpop.permute.xlu1 %202  ;;  %v201_v35 = vpop.permute.xlu0 %200 }
  0xd0   : > { %212 = vst.msk [vmem:[%s694_s29 + $0x21] sm:$0xff] %vm208_vm4, %v203_v34  ;;  %211 = vst.msk [vmem:[%s694_s29 + $0x19] sm:$0xff] %vm208_vm4, %v201_v35 }
  0xd3   : > { %v246_v36 = vpop.permute.xlu1 %245  ;;  %v244_v37 = vpop.permute.xlu0 %243 }
  0xd4   : > { %251 = vst.msk [vmem:[%s694_s29 + $0x18] sm:$0x1] %vm249_vm5, %v246_v36  ;;  %250 = vst.msk [vmem:[%s694_s29] sm:$0x1] %vm249_vm5, %v244_v37 }
  0xd7   : > { %v283_v38 = vpop.permute.xlu1 %282  ;;  %v281_v39 = vpop.permute.xlu0 %280 }
  0xd8   : > { %287 = vst.msk [vmem:[%s694_s29 + $0x29] sm:$0x1] %vm249_vm5, %v283_v38  ;;  %286 = vst.msk [vmem:[%s694_s29 + $0x11] sm:$0x1] %vm249_vm5, %v281_v39 }
  0xd9   : > { %490 = shalt.err (!%p487_p1)
}
  0xda   : > { %s491_s21 = scalar_lea.hbm %s723_s11, 768  ;;  %s495_s26 = scalar_lea.hbm %s771_s1, 3072 }
  0xdb   : > { %p492_p3 = scmp.ne.s32.totalorder %s723_s11, %s491_s21  ;;  %p496_p0 = scmp.lt.u32.totalorder %s723_s11, %s771_s1 }
  0xdc   : > { %p497_p2 = scmp.lt.u32.totalorder %s495_s26, %s491_s21  ;;  %p499_p6 = scmp.lt.u32.totalorder %s491_s21, %s723_s11 }
  0xdd   : > { %p493_p4 = pnand %p492_p3, %p778_p10 }
  0xde   : > { %p498_p7 = por %p497_p2, %p496_p0 }
  0xdf   : > { %p494_p5 = pneg %p493_p4 }
  0xe0   : > { %p500_p11 = por %p499_p6, %p498_p7 }
  0xe2   : > { %p501_p12 = pnand %p500_p11, %p494_p5 }
  0xe4   : > { %504 = shalt.err (!%p501_p12)
}
  0xe5   : > { %s552_s17 = smov 128   ;;  %s553_s27 = smov 8  }
  0xe6   : > { %396 = dma.vmem_to_hbm [thread:$0]  (%p778_p10), %s725_s3, 768, %s723_s11, %s289_s10, %s552_s17, %s552_s17, %s553_s27  }
  0xe7 PF: > { %p407_p8 = scmp.ge.s32.totalorder %s543_s9, 2  ;;  %s318_s28 = sand.u32 1, %s531_s6  }
  0xe8   : > { %p779_p9 = scmp.ne.s32.totalorder %s776_s19, 0  ;;  %s319_s29 = scalar_lea.sflag [#allocation4], %s318_s28 }
  0xea   : > { %p403_p13 = pnand %p407_p8, %p779_p9 }
  0xec   : > { %526 = dma.done.wait (!%p403_p13), %s319_s29, 768  }
  0xed   : > { %528 = vsyncadd (!%p403_p13), %s319_s29, 4294966528  ;;  %p14_p1 = scmp.ge.s32.totalorder %s589_s12, 6   ;;  %s780_s6 = smov %s535_s7 }
  0xee   : > { %s781_s7 = smov %s539_s8  ;;  %s782_s8 = smov %s601_s15 }
  0xef   : > { %s783_s9 = smov %s589_s12  ;;  %16 = sbr.rel (!%p14_p1) target bundleno = 5 (0x5), region = 69 }
  0xf6   :  { %324 = vsyncpa [#allocation3], 1 }
  0xf7   :  { %326 = vsyncpa [#allocation3 + $0x1], 1 }
  0xf8   :  { %327 = vsyncpa [#allocation4], 1 }
  0xf9   :  { %329 = vsyncpa [#allocation4 + $0x1], 1 }

</bundles_post_ra>
